<compile_context>
chip_gen: v6e
topology: v6e:2x2x1
jax: 0.10.0
libtpu: 0.0.40
codegen_flags: <defaults>
</compile_context>

<pallas_src>
import functools

import jax
import jax.numpy as jnp
from jax.experimental import pallas as pl
from jax.experimental.pallas import tpu as pltpu


def _round_up(x, m):
    return (x + m - 1) // m * m


def _cdiv(a, b):
    return -(-a // b)


def _nli_mlp_kernel(h_ref, pms_ref, pls_ref, pmax_ref, pavg_ref,
                    w1a_ref, w1b_ref, w1c_ref, w1d_ref, w1e_ref, w1f_ref,
                    b1_ref, w2_ref, b2_ref, w3_ref, b3_ref,
                    out_ref):
    """Fused: elementwise product + split-W1 dots (== concat @ W1) + MLP."""
    f32 = jnp.float32
    h = h_ref[...]
    pms = pms_ref[...]
    hp = h * pms                                   # h * p_most_sim

    # z1 = [h, pms, h*pms, pls, pmax, pavg] @ W1 + b1, expressed as a sum of
    # six small dots so no lane-axis concatenate is needed in-kernel.
    z1 = (jnp.dot(h, w1a_ref[...], preferred_element_type=f32)
          + jnp.dot(pms, w1b_ref[...], preferred_element_type=f32)
          + jnp.dot(hp, w1c_ref[...], preferred_element_type=f32)
          + jnp.dot(pls_ref[...], w1d_ref[...], preferred_element_type=f32)
          + jnp.dot(pmax_ref[...], w1e_ref[...], preferred_element_type=f32)
          + jnp.dot(pavg_ref[...], w1f_ref[...], preferred_element_type=f32)
          + b1_ref[...])
    z1 = jnp.maximum(z1, 0.0).astype(w2_ref.dtype)   # bf16 operand for next dot

    z2 = jnp.dot(z1, w2_ref[...], preferred_element_type=f32) + b2_ref[...]
    z2 = jnp.maximum(z2, 0.0).astype(w3_ref.dtype)

    # Narrow (8-lane) f32 logit store: ~16x less HBM writeback than a 128-lane
    # padded store; the masked vst is cheap because the store slot has slack.
    out_ref[...] = (jnp.dot(z2, w3_ref[...], preferred_element_type=f32)
                    + b3_ref[...])


def prepare_params(params, embedding_dim, compute_dtype=jnp.bfloat16):
    """One-time (model-load) weight preparation.

    Pads hidden dims to 128 lanes, pads the 3-wide output only to 8 lanes,
    splits W1 row-wise into six [E, H1p] slices (matching the concat order),
    and casts weight matrices to the bf16 compute dtype.  Biases stay f32.
    Hoisted out of the jitted forward so no per-call re-padding happens.
    """
    w1, b1, w2, b2, w3, b3 = params           # logical [in, out] layout
    E = embedding_dim
    H1, H2, OUT = w1.shape[1], w2.shape[1], w3.shape[1]
    H1p, H2p = _round_up(H1, 128), _round_up(H2, 128)
    OUTp = _round_up(OUT, 8)                   # narrow output, not 128

    def pad2(a, rows, cols):
        return jnp.pad(a, ((0, rows - a.shape[0]), (0, cols - a.shape[1])))

    w1p = pad2(w1, 6 * E, H1p).astype(compute_dtype)
    # Slice order matches the concat order: h, pms, h*pms, pls, pmax, pavg.
    w1_slices = tuple(w1p[i * E:(i + 1) * E, :] for i in range(6))
    b1p = pad2(b1, 1, H1p).astype(jnp.float32)
    w2p = pad2(w2, H1p, H2p).astype(compute_dtype)
    b2p = pad2(b2, 1, H2p).astype(jnp.float32)
    w3p = pad2(w3, H2p, OUTp).astype(compute_dtype)
    b3p = pad2(b3, 1, OUTp).astype(jnp.float32)
    kparams = w1_slices + (b1p, w2p, b2p, w3p, b3p)
    return kparams, OUT


@functools.partial(jax.jit, static_argnames=("num_classes", "tile_b"))
def embedding_based_nli_forward(h_emb, p_most_sim_emb, p_least_sim_emb,
                                p_max_emb, p_avg_emb, kparams,
                                num_classes=3, tile_b=2048):
    batch, E = h_emb.shape
    (w1a, _w1b, _w1c, _w1d, _w1e, _w1f, _b1, w2, _b2, w3, _b3) = kparams
    H1p, H2p, OUTp = w1a.shape[1], w2.shape[1], w3.shape[1]
    compute_dtype = w1a.dtype
    itemsize = jnp.dtype(compute_dtype).itemsize

    # ---- batch tiling: pad only to sublane alignment, split near-equally ----
    align = 16 if itemsize < 4 else 8
    padded_a = _round_up(batch, align)
    max_tile = max(align, _round_up(min(tile_b, padded_a), align))
    n_tiles = _cdiv(padded_a, max_tile)
    if n_tiles == 1 and padded_a >= 1024:
        n_tiles = 2          # keep >= 2 grid steps so v7x can feed both TCs
    tile_rows = _round_up(_cdiv(padded_a, n_tiles), align)
    padded_b = n_tiles * tile_rows

    acts = (h_emb, p_most_sim_emb, p_least_sim_emb, p_max_emb, p_avg_emb)
    acts = tuple(a.astype(compute_dtype) for a in acts)   # halves input bytes
    if padded_b != batch:
        acts = tuple(jnp.pad(a, ((0, padded_b - batch), (0, 0))) for a in acts)

    # ---- block specs --------------------------------------------------------
    act_spec = pl.BlockSpec((tile_rows, E), lambda i: (i, 0))
    # Weights/biases: constant block index -> stay VMEM-resident across steps.
    # TODO(synk): pipeline_mode=pl.Buffered(1) on these once single-buffering
    #             of resident weights is load-bearing (large E on v7x VMEM).
    param_specs = [pl.BlockSpec(p.shape, lambda i: (0, 0)) for p in kparams]
    in_specs = [act_spec] * 5 + param_specs
    out_spec = pl.BlockSpec((tile_rows, OUTp), lambda i: (i, 0))

    # ---- compiler params / cost hint ----------------------------------------
    weight_bytes = sum(int(p.size) * jnp.dtype(p.dtype).itemsize
                       for p in kparams)
    act_block_bytes = tile_rows * (5 * E * itemsize + OUTp * 4)
    inter_bytes = tile_rows * ((H1p + H2p) * 4 + E * itemsize)
    vmem_limit = int(min(32 << 20,
                         max(8 << 20,
                             2 * weight_bytes + 2 * act_block_bytes
                             + inter_bytes + (4 << 20))))

    flops = 2 * padded_b * (6 * E * H1p + H1p * H2p + H2p * OUTp) + padded_b * E
    bytes_accessed = padded_b * (5 * E * itemsize + OUTp * 4) + weight_bytes

    out_padded = pl.pallas_call(
        _nli_mlp_kernel,
        out_shape=jax.ShapeDtypeStruct((padded_b, OUTp), jnp.float32),
        grid_spec=pltpu.PrefetchScalarGridSpec(
            num_scalar_prefetch=0,
            grid=(n_tiles,),
            in_specs=in_specs,
            out_specs=out_spec,
        ),
        compiler_params=pltpu.CompilerParams(
            dimension_semantics=("parallel",),
            vmem_limit_bytes=vmem_limit,
        ),
        cost_estimate=pl.CostEstimate(
            flops=flops, transcendentals=0, bytes_accessed=bytes_accessed),
    )(*acts, *kparams)

    return out_padded[:batch, :num_classes]


def init_params(key, embedding_dim, mlp_hidden_dims, out_dim=3):
    """Deterministic synthetic parameters (Linear weights as [in, out])."""
    in_dim = embedding_dim * 6
    dims = [in_dim] + list(mlp_hidden_dims) + [out_dim]
    params = []
    for i in range(len(dims) - 1):
        key, wk, bk = jax.random.split(key, 3)
        fan_in = dims[i]
        scale = 1.0 / jnp.sqrt(fan_in)
        w = jax.random.uniform(wk, (dims[i], dims[i + 1]),
                               minval=-scale, maxval=scale, dtype=jnp.float32)
        b = jax.random.uniform(bk, (1, dims[i + 1]),
                               minval=-scale, maxval=scale, dtype=jnp.float32)
        params += [w, b]
    return tuple(params)


def reference_forward(h, pms, pls, pmax, pavg, params):
    """Pure-JAX f32 reference for correctness check."""
    w1, b1, w2, b2, w3, b3 = params
    x = jnp.concatenate([h, pms, h * pms, pls, pmax, pavg], axis=-1)
    z1 = jnp.maximum(x @ w1 + b1, 0.0)
    z2 = jnp.maximum(z1 @ w2 + b2, 0.0)
    return z2 @ w3 + b3


if __name__ == "__main__":
    batch = 8
    embedding_dim = 32
    mlp_hidden_dims = (64, 32)

    key = jax.random.PRNGKey(0)
    key, k1, k2, k3, k4, k5 = jax.random.split(key, 6)
    h_emb = jax.random.normal(k1, (batch, embedding_dim), dtype=jnp.float32)
    p_most_sim_emb = jax.random.normal(k2, (batch, embedding_dim), dtype=jnp.float32)
    p_least_sim_emb = jax.random.normal(k3, (batch, embedding_dim), dtype=jnp.float32)
    p_max_emb = jax.random.normal(k4, (batch, embedding_dim), dtype=jnp.float32)
    p_avg_emb = jax.random.normal(k5, (batch, embedding_dim), dtype=jnp.float32)

    params = init_params(key, embedding_dim, mlp_hidden_dims)

    # One-time (model-load) weight preparation, outside the jitted forward.
    kparams, out_dim = prepare_params(params, embedding_dim,
                                      compute_dtype=jnp.bfloat16)

    out = embedding_based_nli_forward(
        h_emb, p_most_sim_emb, p_least_sim_emb, p_max_emb, p_avg_emb,
        kparams, num_classes=out_dim)
    out = jax.block_until_ready(out)

    ref = reference_forward(
        h_emb, p_most_sim_emb, p_least_sim_emb, p_max_emb, p_avg_emb, params)
    assert out.shape == (batch, 3), out.shape
    # bf16 compute path vs f32 reference: modest tolerance.
    assert jnp.allclose(out, ref, atol=3e-2, rtol=3e-2), float(
        jnp.max(jnp.abs(out - ref)))

    print("KERNEL_OK")
</pallas_src>

<mosaic_0001>
module attributes {stable_mosaic.version = 11 : i64} {
  func.func @_nli_mlp_kernel(%arg0: i32, %arg1: memref<16x32xbf16, #tpu.memory_space<vmem>>, %arg2: memref<16x32xbf16, #tpu.memory_space<vmem>>, %arg3: memref<16x32xbf16, #tpu.memory_space<vmem>>, %arg4: memref<16x32xbf16, #tpu.memory_space<vmem>>, %arg5: memref<16x32xbf16, #tpu.memory_space<vmem>>, %arg6: memref<32x128xbf16, #tpu.memory_space<vmem>>, %arg7: memref<32x128xbf16, #tpu.memory_space<vmem>>, %arg8: memref<32x128xbf16, #tpu.memory_space<vmem>>, %arg9: memref<32x128xbf16, #tpu.memory_space<vmem>>, %arg10: memref<32x128xbf16, #tpu.memory_space<vmem>>, %arg11: memref<32x128xbf16, #tpu.memory_space<vmem>>, %arg12: memref<1x128xf32, #tpu.memory_space<vmem>>, %arg13: memref<128x128xbf16, #tpu.memory_space<vmem>>, %arg14: memref<1x128xf32, #tpu.memory_space<vmem>>, %arg15: memref<128x8xbf16, #tpu.memory_space<vmem>>, %arg16: memref<1x8xf32, #tpu.memory_space<vmem>>, %arg17: memref<16x8xf32, #tpu.memory_space<vmem>>) attributes {dimension_semantics = [#tpu.dimension_semantics<parallel>], iteration_bounds = array<i64: 1>, scalar_prefetch = 0 : i64, scratch_operands = 0 : i64, tpu.core_type = #tpu.core_type<tc>, window_params = [{transform_indices = @transform_0, window_bounds = array<i64: 16, 32>}, {transform_indices = @transform_1, window_bounds = array<i64: 16, 32>}, {transform_indices = @transform_2, window_bounds = array<i64: 16, 32>}, {transform_indices = @transform_3, window_bounds = array<i64: 16, 32>}, {transform_indices = @transform_4, window_bounds = array<i64: 16, 32>}, {pipeline_mode = #tpu.pipeline_mode<synchronous>, transform_indices = @transform_5, window_bounds = array<i64: 32, 128>}, {pipeline_mode = #tpu.pipeline_mode<synchronous>, transform_indices = @transform_6, window_bounds = array<i64: 32, 128>}, {pipeline_mode = #tpu.pipeline_mode<synchronous>, transform_indices = @transform_7, window_bounds = array<i64: 32, 128>}, {pipeline_mode = #tpu.pipeline_mode<synchronous>, transform_indices = @transform_8, window_bounds = array<i64: 32, 128>}, {pipeline_mode = #tpu.pipeline_mode<synchronous>, transform_indices = @transform_9, window_bounds = array<i64: 32, 128>}, {pipeline_mode = #tpu.pipeline_mode<synchronous>, transform_indices = @transform_10, window_bounds = array<i64: 32, 128>}, {pipeline_mode = #tpu.pipeline_mode<synchronous>, transform_indices = @transform_11, window_bounds = array<i64: 1, 128>}, {pipeline_mode = #tpu.pipeline_mode<synchronous>, transform_indices = @transform_12, window_bounds = array<i64: 128, 128>}, {pipeline_mode = #tpu.pipeline_mode<synchronous>, transform_indices = @transform_13, window_bounds = array<i64: 1, 128>}, {pipeline_mode = #tpu.pipeline_mode<synchronous>, transform_indices = @transform_14, window_bounds = array<i64: 128, 8>}, {pipeline_mode = #tpu.pipeline_mode<synchronous>, transform_indices = @transform_15, window_bounds = array<i64: 1, 8>}, {transform_indices = @transform_16, window_bounds = array<i64: 16, 8>}]} {
    %c0 = arith.constant 0 : index
    %c0_0 = arith.constant 0 : index
    %0 = vector.load %arg1[%c0, %c0_0] : memref<16x32xbf16, #tpu.memory_space<vmem>>, vector<16x32xbf16>
    %c0_1 = arith.constant 0 : index
    %c0_2 = arith.constant 0 : index
    %1 = vector.load %arg2[%c0_1, %c0_2] : memref<16x32xbf16, #tpu.memory_space<vmem>>, vector<16x32xbf16>
    %2 = arith.mulf %0, %1 : vector<16x32xbf16>
    %c0_3 = arith.constant 0 : index
    %c0_4 = arith.constant 0 : index
    %3 = vector.load %arg6[%c0_3, %c0_4] : memref<32x128xbf16, #tpu.memory_space<vmem>>, vector<32x128xbf16>
    %cst = arith.constant dense<0.000000e+00> : vector<16x128xf32>
    %4 = tpu.matmul %0, %3, %cst {dimension_numbers = #tpu.dot_dimension_numbers<[1], [0], [0], [1], [0, 0, 1, 1], [], []>} : vector<16x32xbf16>, vector<32x128xbf16>, vector<16x128xf32> -> vector<16x128xf32>
    %c0_5 = arith.constant 0 : index
    %c0_6 = arith.constant 0 : index
    %5 = vector.load %arg7[%c0_5, %c0_6] : memref<32x128xbf16, #tpu.memory_space<vmem>>, vector<32x128xbf16>
    %cst_7 = arith.constant dense<0.000000e+00> : vector<16x128xf32>
    %6 = tpu.matmul %1, %5, %cst_7 {dimension_numbers = #tpu.dot_dimension_numbers<[1], [0], [0], [1], [0, 0, 1, 1], [], []>} : vector<16x32xbf16>, vector<32x128xbf16>, vector<16x128xf32> -> vector<16x128xf32>
    %7 = arith.addf %4, %6 : vector<16x128xf32>
    %c0_8 = arith.constant 0 : index
    %c0_9 = arith.constant 0 : index
    %8 = vector.load %arg8[%c0_8, %c0_9] : memref<32x128xbf16, #tpu.memory_space<vmem>>, vector<32x128xbf16>
    %cst_10 = arith.constant dense<0.000000e+00> : vector<16x128xf32>
    %9 = tpu.matmul %2, %8, %cst_10 {dimension_numbers = #tpu.dot_dimension_numbers<[1], [0], [0], [1], [0, 0, 1, 1], [], []>} : vector<16x32xbf16>, vector<32x128xbf16>, vector<16x128xf32> -> vector<16x128xf32>
    %10 = arith.addf %7, %9 : vector<16x128xf32>
    %c0_11 = arith.constant 0 : index
    %c0_12 = arith.constant 0 : index
    %11 = vector.load %arg3[%c0_11, %c0_12] : memref<16x32xbf16, #tpu.memory_space<vmem>>, vector<16x32xbf16>
    %c0_13 = arith.constant 0 : index
    %c0_14 = arith.constant 0 : index
    %12 = vector.load %arg9[%c0_13, %c0_14] : memref<32x128xbf16, #tpu.memory_space<vmem>>, vector<32x128xbf16>
    %cst_15 = arith.constant dense<0.000000e+00> : vector<16x128xf32>
    %13 = tpu.matmul %11, %12, %cst_15 {dimension_numbers = #tpu.dot_dimension_numbers<[1], [0], [0], [1], [0, 0, 1, 1], [], []>} : vector<16x32xbf16>, vector<32x128xbf16>, vector<16x128xf32> -> vector<16x128xf32>
    %14 = arith.addf %10, %13 : vector<16x128xf32>
    %c0_16 = arith.constant 0 : index
    %c0_17 = arith.constant 0 : index
    %15 = vector.load %arg4[%c0_16, %c0_17] : memref<16x32xbf16, #tpu.memory_space<vmem>>, vector<16x32xbf16>
    %c0_18 = arith.constant 0 : index
    %c0_19 = arith.constant 0 : index
    %16 = vector.load %arg10[%c0_18, %c0_19] : memref<32x128xbf16, #tpu.memory_space<vmem>>, vector<32x128xbf16>
    %cst_20 = arith.constant dense<0.000000e+00> : vector<16x128xf32>
    %17 = tpu.matmul %15, %16, %cst_20 {dimension_numbers = #tpu.dot_dimension_numbers<[1], [0], [0], [1], [0, 0, 1, 1], [], []>} : vector<16x32xbf16>, vector<32x128xbf16>, vector<16x128xf32> -> vector<16x128xf32>
    %18 = arith.addf %14, %17 : vector<16x128xf32>
    %c0_21 = arith.constant 0 : index
    %c0_22 = arith.constant 0 : index
    %19 = vector.load %arg5[%c0_21, %c0_22] : memref<16x32xbf16, #tpu.memory_space<vmem>>, vector<16x32xbf16>
    %c0_23 = arith.constant 0 : index
    %c0_24 = arith.constant 0 : index
    %20 = vector.load %arg11[%c0_23, %c0_24] : memref<32x128xbf16, #tpu.memory_space<vmem>>, vector<32x128xbf16>
    %cst_25 = arith.constant dense<0.000000e+00> : vector<16x128xf32>
    %21 = tpu.matmul %19, %20, %cst_25 {dimension_numbers = #tpu.dot_dimension_numbers<[1], [0], [0], [1], [0, 0, 1, 1], [], []>} : vector<16x32xbf16>, vector<32x128xbf16>, vector<16x128xf32> -> vector<16x128xf32>
    %22 = arith.addf %18, %21 : vector<16x128xf32>
    %c0_26 = arith.constant 0 : index
    %c0_27 = arith.constant 0 : index
    %23 = vector.load %arg12[%c0_26, %c0_27] : memref<1x128xf32, #tpu.memory_space<vmem>>, vector<1x128xf32>
    %24 = vector.broadcast %23 : vector<1x128xf32> to vector<16x128xf32>
    %25 = arith.addf %22, %24 : vector<16x128xf32>
    %cst_28 = arith.constant 0.000000e+00 : f32
    %26 = vector.broadcast %cst_28 : f32 to vector<16x128xf32>
    %27 = arith.maximumf %25, %26 : vector<16x128xf32>
    %28 = arith.truncf %27 : vector<16x128xf32> to vector<16x128xbf16>
    %c0_29 = arith.constant 0 : index
    %c0_30 = arith.constant 0 : index
    %29 = vector.load %arg13[%c0_29, %c0_30] : memref<128x128xbf16, #tpu.memory_space<vmem>>, vector<128x128xbf16>
    %cst_31 = arith.constant dense<0.000000e+00> : vector<16x128xf32>
    %30 = tpu.matmul %28, %29, %cst_31 {dimension_numbers = #tpu.dot_dimension_numbers<[1], [0], [0], [1], [0, 0, 1, 1], [], []>} : vector<16x128xbf16>, vector<128x128xbf16>, vector<16x128xf32> -> vector<16x128xf32>
    %c0_32 = arith.constant 0 : index
    %c0_33 = arith.constant 0 : index
    %31 = vector.load %arg14[%c0_32, %c0_33] : memref<1x128xf32, #tpu.memory_space<vmem>>, vector<1x128xf32>
    %32 = vector.broadcast %31 : vector<1x128xf32> to vector<16x128xf32>
    %33 = arith.addf %30, %32 : vector<16x128xf32>
    %cst_34 = arith.constant 0.000000e+00 : f32
    %34 = vector.broadcast %cst_34 : f32 to vector<16x128xf32>
    %35 = arith.maximumf %33, %34 : vector<16x128xf32>
    %36 = arith.truncf %35 : vector<16x128xf32> to vector<16x128xbf16>
    %c0_35 = arith.constant 0 : index
    %c0_36 = arith.constant 0 : index
    %37 = vector.load %arg15[%c0_35, %c0_36] : memref<128x8xbf16, #tpu.memory_space<vmem>>, vector<128x8xbf16>
    %cst_37 = arith.constant dense<0.000000e+00> : vector<16x8xf32>
    %38 = tpu.matmul %36, %37, %cst_37 {dimension_numbers = #tpu.dot_dimension_numbers<[1], [0], [0], [1], [0, 0, 1, 1], [], []>} : vector<16x128xbf16>, vector<128x8xbf16>, vector<16x8xf32> -> vector<16x8xf32>
    %c0_38 = arith.constant 0 : index
    %c0_39 = arith.constant 0 : index
    %39 = vector.load %arg16[%c0_38, %c0_39] : memref<1x8xf32, #tpu.memory_space<vmem>>, vector<1x8xf32>
    %40 = vector.broadcast %39 : vector<1x8xf32> to vector<16x8xf32>
    %41 = arith.addf %38, %40 : vector<16x8xf32>
    %c0_40 = arith.constant 0 : index
    %c0_41 = arith.constant 0 : index
    %42 = vector.load %arg17[%c0_40, %c0_41] : memref<16x8xf32, #tpu.memory_space<vmem>>, vector<16x8xf32>
    tpu.vector_store %arg17[%c0_40, %c0_41], %41 {strides = array<i32>} : memref<16x8xf32, #tpu.memory_space<vmem>>, vector<16x8xf32>,
    return
  }
  func.func @transform_0(%arg0: i32) -> (i32, i32) {
    %c0_i32 = arith.constant 0 : i32
    %c0_i32_0 = arith.constant 0 : i32
    return %arg0, %c0_i32 : i32, i32
  }
  func.func @transform_1(%arg0: i32) -> (i32, i32) {
    %c0_i32 = arith.constant 0 : i32
    %c0_i32_0 = arith.constant 0 : i32
    return %arg0, %c0_i32 : i32, i32
  }
  func.func @transform_2(%arg0: i32) -> (i32, i32) {
    %c0_i32 = arith.constant 0 : i32
    %c0_i32_0 = arith.constant 0 : i32
    return %arg0, %c0_i32 : i32, i32
  }
  func.func @transform_3(%arg0: i32) -> (i32, i32) {
    %c0_i32 = arith.constant 0 : i32
    %c0_i32_0 = arith.constant 0 : i32
    return %arg0, %c0_i32 : i32, i32
  }
  func.func @transform_4(%arg0: i32) -> (i32, i32) {
    %c0_i32 = arith.constant 0 : i32
    %c0_i32_0 = arith.constant 0 : i32
    return %arg0, %c0_i32 : i32, i32
  }
  func.func @transform_5(%arg0: i32) -> (i32, i32) {
    %c0_i32 = arith.constant 0 : i32
    %c0_i32_0 = arith.constant 0 : i32
    %c0_i32_1 = arith.constant 0 : i32
    return %c0_i32, %c0_i32_0 : i32, i32
  }
  func.func @transform_6(%arg0: i32) -> (i32, i32) {
    %c0_i32 = arith.constant 0 : i32
    %c0_i32_0 = arith.constant 0 : i32
    %c0_i32_1 = arith.constant 0 : i32
    return %c0_i32, %c0_i32_0 : i32, i32
  }
  func.func @transform_7(%arg0: i32) -> (i32, i32) {
    %c0_i32 = arith.constant 0 : i32
    %c0_i32_0 = arith.constant 0 : i32
    %c0_i32_1 = arith.constant 0 : i32
    return %c0_i32, %c0_i32_0 : i32, i32
  }
  func.func @transform_8(%arg0: i32) -> (i32, i32) {
    %c0_i32 = arith.constant 0 : i32
    %c0_i32_0 = arith.constant 0 : i32
    %c0_i32_1 = arith.constant 0 : i32
    return %c0_i32, %c0_i32_0 : i32, i32
  }
  func.func @transform_9(%arg0: i32) -> (i32, i32) {
    %c0_i32 = arith.constant 0 : i32
    %c0_i32_0 = arith.constant 0 : i32
    %c0_i32_1 = arith.constant 0 : i32
    return %c0_i32, %c0_i32_0 : i32, i32
  }
  func.func @transform_10(%arg0: i32) -> (i32, i32) {
    %c0_i32 = arith.constant 0 : i32
    %c0_i32_0 = arith.constant 0 : i32
    %c0_i32_1 = arith.constant 0 : i32
    return %c0_i32, %c0_i32_0 : i32, i32
  }
  func.func @transform_11(%arg0: i32) -> (i32, i32) {
    %c0_i32 = arith.constant 0 : i32
    %c0_i32_0 = arith.constant 0 : i32
    %c0_i32_1 = arith.constant 0 : i32
    return %c0_i32, %c0_i32_0 : i32, i32
  }
  func.func @transform_12(%arg0: i32) -> (i32, i32) {
    %c0_i32 = arith.constant 0 : i32
    %c0_i32_0 = arith.constant 0 : i32
    %c0_i32_1 = arith.constant 0 : i32
    return %c0_i32, %c0_i32_0 : i32, i32
  }
  func.func @transform_13(%arg0: i32) -> (i32, i32) {
    %c0_i32 = arith.constant 0 : i32
    %c0_i32_0 = arith.constant 0 : i32
    %c0_i32_1 = arith.constant 0 : i32
    return %c0_i32, %c0_i32_0 : i32, i32
  }
  func.func @transform_14(%arg0: i32) -> (i32, i32) {
    %c0_i32 = arith.constant 0 : i32
    %c0_i32_0 = arith.constant 0 : i32
    %c0_i32_1 = arith.constant 0 : i32
    return %c0_i32, %c0_i32_0 : i32, i32
  }
  func.func @transform_15(%arg0: i32) -> (i32, i32) {
    %c0_i32 = arith.constant 0 : i32
    %c0_i32_0 = arith.constant 0 : i32
    %c0_i32_1 = arith.constant 0 : i32
    return %c0_i32, %c0_i32_0 : i32, i32
  }
  func.func @transform_16(%arg0: i32) -> (i32, i32) {
    %c0_i32 = arith.constant 0 : i32
    %c0_i32_0 = arith.constant 0 : i32
    return %arg0, %c0_i32 : i32, i32
  }
}

</mosaic_0001>

<bundles_post_ra>
// kernel: embedding_based_nli_forward.1
= control target key start
LH: loop header
LB: loop body
LE: loop exit
PB: predicated region body
PF: predicated region fallthrough
CT: control target
= control target key end

     0   :  { %v913_v0 = vmov 0.0   ;;  %vm914_vm0 = vmmov 0   ;;  %vm85_vm1 = vcmask 261120   ;;  %vm704_vm2 = vcmask 64512   ;;  %s1170_s6 = inlined_call_operand.vmem [shape: bf16[32,128], index: 6, kind: input, shape index: {}]   ;;  %s1171_s5 = inlined_call_operand.vmem [shape: bf16[32,128], index: 5, kind: input, shape index: {}]   ;;  %s1172_s1 = inlined_call_operand.vmem [shape: bf16[16,32], index: 1, kind: input, shape index: {}]   ;;  %s1173_s0 = inlined_call_operand.vmem [shape: bf16[16,32], index: 0, kind: input, shape index: {}]   ;;  %s1174_s7 = inlined_call_operand.vmem [shape: bf16[32,128], index: 7, kind: input, shape index: {}]   ;;  %s1175_s8 = inlined_call_operand.vmem [shape: bf16[32,128], index: 8, kind: input, shape index: {}]   ;;  %s1176_s2 = inlined_call_operand.vmem [shape: bf16[16,32], index: 2, kind: input, shape index: {}]   ;;  %s1177_s9 = inlined_call_operand.vmem [shape: bf16[32,128], index: 9, kind: input, shape index: {}]   ;;  %s1178_s10 = inlined_call_operand.vmem [shape: bf16[32,128], index: 10, kind: input, shape index: {}]   ;;  %s1179_s3 = inlined_call_operand.vmem [shape: bf16[16,32], index: 3, kind: input, shape index: {}]   ;;  %s1180_s4 = inlined_call_operand.vmem [shape: bf16[16,32], index: 4, kind: input, shape index: {}]   ;;  %s1181_s12 = inlined_call_operand.vmem [shape: bf16[128,128], index: 12, kind: input, shape index: {}]   ;;  %s1182_s14 = inlined_call_operand.vmem [shape: bf16[128,8], index: 14, kind: input, shape index: {}]   ;;  %s1183_s11 = inlined_call_operand.vmem [shape: f32[1,128], index: 11, kind: input, shape index: {}]   ;;  %s1184_s13 = inlined_call_operand.vmem [shape: f32[1,128], index: 13, kind: input, shape index: {}]   ;;  %s1185_s15 = inlined_call_operand.vmem [shape: f32[1,8], index: 15, kind: input, shape index: {}]   ;;  %s1186_s16 = inlined_call_operand.vmem [shape: f32[16,8], index: 16, kind: output, shape index: {}]  }
   0x1   :  { %1188 = sst [smem:[#allocation2_spill]] %s1170_s6  ;;  %790 = vmatprep.subr.bf16.mxu0 %v913_v0  ;;  %798 = vmatprep.subr.bf16.mxu1 %v913_v0  ;;  %v881_v2 = vld [vmem:[%s1171_s5 + $0x8] sm:$0xff]   ;;  %v883_v4 = vld [vmem:[%s1171_s5] sm:$0xff]   ;;  %v897_v25 = vld [vmem:[%s1181_s12 + $0x38] sm:$0xff]  }
   0x2   :  { %s1189_s23 = sld [smem:[#allocation2_spill]]  ;;  %794 = vmatprep.mubr.msk.bf16.mxu0 %vm914_vm0, %v913_v0  ;;  %802 = vmatprep.mubr.msk.bf16.mxu1 %vm914_vm0, %v913_v0  ;;  %v56_v5 = vld [vmem:[%s1172_s1] sm:$0xf]  ;;  %v57_v6 = vld [vmem:[%s1172_s1 + $0x4] sm:$0xf]  ;;  %v886_v11 = vld [vmem:[%s1174_s7 + $0x8] sm:$0xff]  }
   0x3   :  { %799 = vmatpush3.bf16.msra.mxu1 %v881_v2  ;;  %v54_v7 = vld [vmem:[%s1173_s0] sm:$0xf]  ;;  %v711_v8 = vcombine.low %v56_v5, %v57_v6  ;;  %v55_v9 = vld [vmem:[%s1173_s0 + $0x4] sm:$0xf]  ;;  %v887_v12 = vld [vmem:[%s1175_s8 + $0x8] sm:$0xff]  }
   0x4   :  { %800 = vmatprep.subr.bf16.mxu1 %v913_v0  ;;  %v715_v10 = vcombine.low %v54_v7, %v55_v9  ;;  %v58_v13 = vmul.bf16 %v56_v5, %v54_v7  ;;  %v59_v14 = vmul.bf16 %v57_v6, %v55_v9  ;;  %v888_v15 = vld [vmem:[%s1174_s7] sm:$0xff]   ;;  %v891_v19 = vld [vmem:[%s1177_s9 + $0x8] sm:$0xff]   ;;  %v898_v26 = vld [vmem:[%s1181_s12 + $0x30] sm:$0xff]  }
   0x5   :  { %v889_v16 = vld [vmem:[%s1175_s8] sm:$0xff]   ;;  %v892_v20 = vld [vmem:[%s1178_s10 + $0x8] sm:$0xff]   ;;  %v901_v29 = vld [vmem:[%s1181_s12 + $0x18] sm:$0xff]  }
   0x6   :  { %v719_v17 = vcombine.low %v58_v13, %v59_v14  ;;  %v890_v18 = vld [vmem:[%s1176_s2] sm:$0xff]   ;;  %v899_v27 = vld [vmem:[%s1181_s12 + $0x28] sm:$0xff]   ;;  %v902_v30 = vld [vmem:[%s1181_s12 + $0x10] sm:$0xff]  }
   0x7   :  { %801 = vmatpush3.bf16.msra.mxu1 %v883_v4  ;;  %v893_v21 = vld [vmem:[%s1177_s9] sm:$0xff]   ;;  %v903_v31 = vld [vmem:[%s1181_s12 + $0x8] sm:$0xff]   ;;  %v905_v33 = vld [vmem:[%s1182_s14 + $0x38] sm:$0xff]  }
   0x8   :  { %v880_v1 = vld [vmem:[%s1189_s23 + $0x8] sm:$0xff]   ;;  %v882_v3 = vld [vmem:[%s1189_s23] sm:$0xff]   ;;  %814 = vmatprep.subr.bf16.mxu1 %v913_v0  ;;  %v906_v34 = vld [vmem:[%s1182_s14 + $0x30] sm:$0xff]  }
   0x9   :  { %791 = vmatpush3.bf16.msra.mxu0 %v880_v1  ;;  %v894_v22 = vld [vmem:[%s1178_s10] sm:$0xff]   ;;  %v907_v35 = vld [vmem:[%s1182_s14 + $0x28] sm:$0xff]   ;;  %v909_v37 = vld [vmem:[%s1182_s14 + $0x18] sm:$0xff]  }
   0xa   :  { %792 = vmatprep.subr.bf16.mxu0 %v913_v0  ;;  %803 = vmatmul.mubr.msk.bf16.vlgmr.msra.gmra.mxu1 %vm85_vm1, %v715_v10  ;;  %v895_v23 = vld [vmem:[%s1179_s3] sm:$0xff]  }
   0xb   :  { %815 = vmatpush3.bf16.msra.mxu1 %v887_v12  ;;  %818 = vmatprep.mubr.msk.bf16.mxu1 %vm914_vm0, %v913_v0  ;;  %v896_v24 = vld [vmem:[%s1180_s4] sm:$0xff]  }
   0xc   :  { %816 = vmatprep.subr.bf16.mxu1 %v913_v0  ;;  %v900_v28 = vld [vmem:[%s1181_s12 + $0x20] sm:$0xff]  }
   0xd   :  { %793 = vmatpush3.bf16.msra.mxu0 %v882_v3  ;;  %v904_v32 = vld [vmem:[%s1181_s12] sm:$0xff]  }
   0xe   :  { %806 = vmatprep.subr.bf16.mxu0 %v913_v0  ;;  %v908_v36 = vld [vmem:[%s1182_s14 + $0x20] sm:$0xff]  }
   0xf   :  { %817 = vmatpush3.bf16.msra.mxu1 %v889_v16  ;;  %v735_v3 = vld [vmem:[%s1183_s11] ss:$0 sm:$0xff]  ;;  %v911_v16 = vld [vmem:[%s1182_s14 + $0x8] sm:$0xff]  }
  0x10   :  { %795 = vmatmul.mubr.msk.bf16.vlgmr.msra.gmra.mxu0 %vm85_vm1, %v711_v8  ;;  %830 = vmatprep.subr.bf16.mxu1 %v913_v0 }
  0x11   :  { %807 = vmatpush3.bf16.msra.mxu0 %v886_v11  ;;  %810 = vmatprep.mubr.msk.bf16.mxu0 %vm914_vm0, %v913_v0 }
  0x12   :  { %808 = vmatprep.subr.bf16.mxu0 %v913_v0  ;;  %819 = vmatmul.mubr.msk.bf16.vlgmr.msra.gmra.mxu1 %vm85_vm1, %v890_v18  ;;  %v736_v18 = vld [vmem:[%s1184_s13] ss:$0 sm:$0xff] }
  0x13   :  { %831 = vmatpush3.bf16.msra.mxu1 %v892_v20  ;;  %834 = vmatprep.mubr.msk.bf16.mxu1 %vm914_vm0, %v913_v0 }
  0x14   :  { %832 = vmatprep.subr.bf16.mxu1 %v913_v0 }
  0x15   :  { %809 = vmatpush3.bf16.msra.mxu0 %v888_v15  ;;  %v910_v15 = vld [vmem:[%s1182_s14 + $0x10] sm:$0xff]  }
  0x16   :  { %822 = vmatprep.subr.bf16.mxu0 %v913_v0 }
  0x17   :  { %833 = vmatpush3.bf16.msra.mxu1 %v894_v22 }
  0x18   :  { %811 = vmatmul.mubr.msk.bf16.vlgmr.msra.gmra.mxu0 %vm85_vm1, %v719_v17  ;;  %858 = vmatprep.subr.bf16.mxu1 %v913_v0  ;;  %v912_v17 = vld [vmem:[%s1182_s14] sm:$0xff]  }
  0x19   :  { %823 = vmatpush3.bf16.msra.mxu0 %v891_v19  ;;  %826 = vmatprep.mubr.msk.bf16.mxu0 %vm914_vm0, %v913_v0 }
  0x1a   :  { %824 = vmatprep.subr.bf16.mxu0 %v913_v0  ;;  %835 = vmatmul.mubr.msk.bf16.vlgmr.msra.gmra.mxu1 %vm85_vm1, %v896_v24 }
  0x1b   :  { %874 = vmatprep.mubr.msk.bf16.mxu1 %vm914_vm0, %v913_v0  ;;  %859 = vmatpush3.bf16.msra.mxu1 %v905_v33 }
  0x1c   :  { %860 = vmatprep.subr.bf16.mxu1 %v913_v0 }
  0x1d   :  { %825 = vmatpush3.bf16.msra.mxu0 %v893_v21 }
  0x1e   :  { %838 = vmatprep.subr.bf16.mxu0 %v913_v0 }
  0x1f   :  { %861 = vmatpush3.bf16.msra.mxu1 %v906_v34 }
  0x20   :  { %827 = vmatmul.mubr.msk.bf16.vlgmr.msra.gmra.mxu0 %vm85_vm1, %v895_v23  ;;  %862 = vmatprep.subr.bf16.mxu1 %v913_v0 }
  0x21   :  { %854 = vmatprep.mubr.msk.bf16.mxu0 %vm914_vm0, %v913_v0  ;;  %839 = vmatpush3.bf16.msra.mxu0 %v897_v25 }
  0x22   :  { %840 = vmatprep.subr.bf16.mxu0 %v913_v0 }
  0x23   :  { %863 = vmatpush3.bf16.msra.mxu1 %v907_v35 }
  0x24   :  { %864 = vmatprep.subr.bf16.mxu1 %v913_v0 }
  0x25   :  { %841 = vmatpush3.bf16.msra.mxu0 %v898_v26 }
  0x26   :  { %842 = vmatprep.subr.bf16.mxu0 %v913_v0 }
  0x27   :  { %865 = vmatpush3.bf16.msra.mxu1 %v908_v36 }
  0x28   :  { %866 = vmatprep.subr.bf16.mxu1 %v913_v0 }
  0x29   :  { %843 = vmatpush3.bf16.msra.mxu0 %v899_v27 }
  0x2a   :  { %844 = vmatprep.subr.bf16.mxu0 %v913_v0 }
  0x2b   :  { %867 = vmatpush3.bf16.msra.mxu1 %v909_v37 }
  0x2c   :  { %868 = vmatprep.subr.bf16.mxu1 %v913_v0 }
  0x2d   :  { %845 = vmatpush3.bf16.msra.mxu0 %v900_v28 }
  0x2e   :  { %846 = vmatprep.subr.bf16.mxu0 %v913_v0 }
  0x2f   :  { %869 = vmatpush3.bf16.msra.mxu1 %v910_v15 }
  0x30   :  { %870 = vmatprep.subr.bf16.mxu1 %v913_v0 }
  0x31   :  { %847 = vmatpush3.bf16.msra.mxu0 %v901_v29 }
  0x32   :  { %848 = vmatprep.subr.bf16.mxu0 %v913_v0 }
  0x33   :  { %871 = vmatpush3.bf16.msra.mxu1 %v911_v16 }
  0x34   :  { %872 = vmatprep.subr.bf16.mxu1 %v913_v0 }
  0x35   :  { %849 = vmatpush3.bf16.msra.mxu0 %v902_v30 }
  0x36   :  { %850 = vmatprep.subr.bf16.mxu0 %v913_v0 }
  0x37   :  { %873 = vmatpush3.bf16.msra.mxu1 %v912_v17 }
  0x39   :  { %851 = vmatpush3.bf16.msra.mxu0 %v903_v31 }
  0x3a   :  { %852 = vmatprep.subr.bf16.mxu0 %v913_v0  ;;  %v745_v0 = vld [vmem:[%s1185_s15] ss:$0 sm:$0xff] }
  0x3d   :  { %853 = vmatpush3.bf16.msra.mxu0 %v904_v32 }
  0xca   :  { %v184_v39 = vpop.f32.mrf.mxu1 }
  0xcc   :  { %v804_v41 = vpop.f32.mrf.mxu1 }
  0xce   :  { %v187_v43 = vpop.f32.mrf.mxu1 }
  0xd0   :  { %v123_v38 = vpop.f32.mrf.mxu0  ;;  %v805_v45 = vpop.f32.mrf.mxu1 }
  0xd1   :  { %v185_v47 = vadd.f32 %v184_v39, %v123_v38 }
  0xd2   :  { %v796_v40 = vpop.f32.mrf.mxu0  ;;  %v318_v48 = vpop.f32.mrf.mxu1 }
  0xd4   :  { %v126_v42 = vpop.f32.mrf.mxu0  ;;  %v820_v51 = vpop.f32.mrf.mxu1 }
  0xd5   :  { %v188_v53 = vadd.f32 %v187_v43, %v126_v42 }
  0xd6   :  { %v797_v44 = vpop.f32.mrf.mxu0  ;;  %v321_v54 = vpop.f32.mrf.mxu1 }
  0xd8   :  { %v249_v46 = vpop.f32.mrf.mxu0  ;;  %v821_v58 = vpop.f32.mrf.mxu1 }
  0xd9   :  { %v256_v50 = vadd.f32 %v249_v46, %v185_v47 }
  0xda   :  { %v812_v49 = vpop.f32.mrf.mxu0  ;;  %v456_v61 = vpop.f32.mrf.mxu1 }
  0xdb   :  { %v325_v56 = vadd.f32 %v318_v48, %v256_v50 }
  0xdc   :  { %v252_v52 = vpop.f32.mrf.mxu0  ;;  %v836_v2 = vpop.f32.mrf.mxu1 }
  0xdd   :  { %v257_v57 = vadd.f32 %v252_v52, %v188_v53 }
  0xde   :  { %v813_v55 = vpop.f32.mrf.mxu0  ;;  %v459_v6 = vpop.f32.mrf.mxu1 }
  0xdf   :  { %v326_v63 = vadd.f32 %v321_v54, %v257_v57 }
  0xe0   :  { %v387_v59 = vpop.f32.mrf.mxu0  ;;  %v837_v10 = vpop.f32.mrf.mxu1 }
  0xe1   :  { %v394_v60 = vadd.f32 %v387_v59, %v325_v56 }
  0xe2   :  { %v828_v62 = vpop.f32.mrf.mxu0 }
  0xe3   :  { %v463_v1 = vadd.f32 %v456_v61, %v394_v60 }
  0xe4   :  { %v390_v4 = vpop.f32.mrf.mxu0 }
  0xe5   :  { %v395_v5 = vadd.f32 %v390_v4, %v326_v63  ;;  %v472_v8 = vadd.f32 %v735_v3, %v463_v1 }
  0xe6   :  { %v829_v7 = vpop.f32.mrf.mxu0 }
  0xe7   :  { %v464_v9 = vadd.f32 %v459_v6, %v395_v5  ;;  %v474_v12 = vmax.f32 %v472_v8, 0.0 }
  0xe9   :  { %v473_v11 = vadd.f32 %v735_v3, %v464_v9 }
  0xeb   :  { %v475_v13 = vmax.f32 %v473_v11, 0.0 }
  0xed   :  { %v476_v14 = vpack.c.bf16 %v475_v13, %v474_v12 }
  0xef   :  { %855 = vmatmul.mubr.bf16.vlgmr.msra.gmra.mxu0 %v476_v14 }
 0x1af   :  { %v582_v19 = vpop.f32.mrf.mxu0 }
 0x1b0   :  { %v583_v21 = vadd.f32 %v736_v18, %v582_v19 }
 0x1b1   :  { %v856_v20 = vpop.f32.mrf.mxu0 }
 0x1b2   :  { %v589_v25 = vmax.f32 %v583_v21, 0.0 }
 0x1b3   :  { %v585_v22 = vpop.f32.mrf.mxu0 }
 0x1b4   :  { %v586_v23 = vadd.f32 %v736_v18, %v585_v22 }
 0x1b5   :  { %v857_v24 = vpop.f32.mrf.mxu0 }
 0x1b6   :  { %v590_v26 = vmax.f32 %v586_v23, 0.0 }
 0x1b8   :  { %v591_v27 = vpack.c.bf16 %v590_v26, %v589_v25 }
 0x1ba   :  { %875 = vmatmul.mubr.bf16.vlgmr.msra.gmra.mxu1 %v591_v27 }
 0x27a   :  { %v697_v28 = vpop.f32.mrf.mxu1 }
 0x27b   :  { %v698_v29 = vadd.f32 %v745_v0, %v697_v28 }
 0x27c   :  { %v876_v30 = vpop.f32.mrf.mxu1 }
 0x27d   :  { %705 = vst.msk [vmem:[%s1186_s16] sm:$0xff] %vm704_vm2, %v698_v29 }
 0x27e   :  { %v700_v31 = vpop.f32.mrf.mxu1 }
 0x27f   :  { %v701_v32 = vadd.f32 %v745_v0, %v700_v31 }
 0x280   :  { %v877_v33 = vpop.f32.mrf.mxu1 }
 0x281   :  { %706 = vst.msk [vmem:[%s1186_s16 + $0x8] sm:$0xff] %vm704_vm2, %v701_v32 }

</bundles_post_ra>
